<compile_context>
chip_gen: v6e
topology: v6e:2x2x1
jax: 0.10.0
libtpu: 0.0.40
codegen_flags: <defaults>
</compile_context>

<pallas_src>
import jax
import jax.numpy as jnp
from jax import lax
from jax.experimental import pallas as pl
from jax.experimental.pallas import tpu as pltpu

IN_FEATURES = 6144
OUT_FEATURES = 10

# 512 f32 rows = 12 MiB per x buffer -> 24 MiB double-buffered + ~0.4 MiB
# weight/bias/output: fits v7x (64 MiB VMEM) and v5e/v6e once the scoped VMEM
# limit is raised. (v6e could go to 1024 for a few extra % of roofline.)
MAX_TILE_N = 512


def _round_up(x, m):
    return ((x + m - 1) // m) * m


def linear_logsoftmax_kernel(x_ref, w_ref, b_ref, o_ref):
    # x_ref: (tile_n, K), w_ref: (10, K) PyTorch layout, b_ref: (1, 10).
    x = x_ref[...]
    w = w_ref[...]
    b = b_ref[...]
    # trans_b contraction: (tile_n, K) x (10, K) -> (tile_n, 10), f32 accumulate.
    logits = lax.dot_general(
        x, w,
        dimension_numbers=(((1,), (1,)), ((), ())),
        preferred_element_type=jnp.float32,
    ) + b
    # Numerically stable log-softmax over the 10-wide class axis.
    m = jnp.max(logits, axis=-1, keepdims=True)
    shifted = logits - m
    lse = jnp.log(jnp.sum(jnp.exp(shifted), axis=-1, keepdims=True))
    o_ref[...] = (shifted - lse).astype(o_ref.dtype)


def derived_model8_forward(x, weight, bias):
    """x: (N, 6144) f32; weight: (10, 6144) f32 (PyTorch layout); bias: (10,)."""
    n = x.shape[0]
    b2d = bias.reshape(1, OUT_FEATURES)  # 2-D for TPU layout

    # Tile the batch: small batches get a single right-sized block, large
    # batches stream 512-row tiles through the BlockSpec pipeline.
    tile_n = min(MAX_TILE_N, _round_up(n, 8))
    grid = (pl.cdiv(n, tile_n),)

    return pl.pallas_call(
        linear_logsoftmax_kernel,
        out_shape=jax.ShapeDtypeStruct((n, OUT_FEATURES), jnp.float32),
        grid=grid,
        in_specs=[
            # x: streamed per batch tile.
            pl.BlockSpec((tile_n, IN_FEATURES), lambda i: (i, 0)),
            # weight/bias: resident across the whole grid.
            pl.BlockSpec((OUT_FEATURES, IN_FEATURES), lambda i: (0, 0)),
            pl.BlockSpec((1, OUT_FEATURES), lambda i: (0, 0)),
        ],
        out_specs=pl.BlockSpec((tile_n, OUT_FEATURES), lambda i: (i, 0)),
        compiler_params=pltpu.CompilerParams(
            dimension_semantics=("parallel",),
            vmem_limit_bytes=48 << 20,
        ),
    )(x, weight, b2d)


if __name__ == "__main__":
    key = jax.random.PRNGKey(0)
    k_x, k_w, k_b = jax.random.split(key, 3)

    batch = 8
    # Deterministic parameter init mimicking nn.Linear's U(-1/sqrt(K), 1/sqrt(K)).
    bound = 1.0 / (IN_FEATURES ** 0.5)
    weight = jax.random.uniform(
        k_w, (OUT_FEATURES, IN_FEATURES), jnp.float32, -bound, bound)
    bias = jax.random.uniform(
        k_b, (OUT_FEATURES,), jnp.float32, -bound, bound)
    x = jax.random.normal(k_x, (batch, IN_FEATURES), jnp.float32)

    out = derived_model8_forward(x, weight, bias)
    out = jax.block_until_ready(out)

    # Sanity check against plain-JAX reference.
    ref_logits = x @ weight.T + bias
    ref = jax.nn.log_softmax(ref_logits, axis=1)
    assert out.shape == (batch, OUT_FEATURES)
    assert jnp.allclose(out, ref, atol=1e-4, rtol=1e-4)

    print("KERNEL_OK")
</pallas_src>

<mosaic_0001>
module attributes {stable_mosaic.version = 11 : i64} {
  func.func @linear_logsoftmax_kernel(%arg0: i32, %arg1: memref<8x6144xf32, #tpu.memory_space<vmem>>, %arg2: memref<10x6144xf32, #tpu.memory_space<vmem>>, %arg3: memref<1x10xf32, #tpu.memory_space<vmem>>, %arg4: memref<8x10xf32, #tpu.memory_space<vmem>>) attributes {dimension_semantics = [#tpu.dimension_semantics<parallel>], iteration_bounds = array<i64: 1>, scalar_prefetch = 0 : i64, scratch_operands = 0 : i64, tpu.core_type = #tpu.core_type<tc>, window_params = [{transform_indices = @transform_0, window_bounds = array<i64: 8, 6144>}, {pipeline_mode = #tpu.pipeline_mode<synchronous>, transform_indices = @transform_1, window_bounds = array<i64: 10, 6144>}, {pipeline_mode = #tpu.pipeline_mode<synchronous>, transform_indices = @transform_2, window_bounds = array<i64: 1, 10>}, {transform_indices = @transform_3, window_bounds = array<i64: 8, 10>}]} {
    %c0 = arith.constant 0 : index
    %c0_0 = arith.constant 0 : index
    %0 = vector.load %arg1[%c0, %c0_0] : memref<8x6144xf32, #tpu.memory_space<vmem>>, vector<8x6144xf32>
    %c0_1 = arith.constant 0 : index
    %c0_2 = arith.constant 0 : index
    %1 = vector.load %arg2[%c0_1, %c0_2] : memref<10x6144xf32, #tpu.memory_space<vmem>>, vector<10x6144xf32>
    %c0_3 = arith.constant 0 : index
    %c0_4 = arith.constant 0 : index
    %2 = vector.load %arg3[%c0_3, %c0_4] : memref<1x10xf32, #tpu.memory_space<vmem>>, vector<1x10xf32>
    %cst = arith.constant dense<0.000000e+00> : vector<8x10xf32>
    %3 = tpu.matmul %0, %1, %cst {dimension_numbers = #tpu.dot_dimension_numbers<[1], [1], [0], [0], [0, 0, 1, 0], [], []>} : vector<8x6144xf32>, vector<10x6144xf32>, vector<8x10xf32> -> vector<8x10xf32>
    %4 = vector.broadcast %2 : vector<1x10xf32> to vector<8x10xf32>
    %5 = arith.addf %3, %4 : vector<8x10xf32>
    %cst_5 = arith.constant dense<0xFF800000> : vector<8xf32>
    %6 = vector.multi_reduction <maximumf>, %5, %cst_5 [1] : vector<8x10xf32> to vector<8xf32>
    %7 = vector.shape_cast %6 : vector<8xf32> to vector<8x1xf32>
    %8 = vector.broadcast %7 : vector<8x1xf32> to vector<8x10xf32>
    %9 = arith.subf %5, %8 : vector<8x10xf32>
    %10 = math.exp %9 : vector<8x10xf32>
    %cst_6 = arith.constant dense<0.000000e+00> : vector<8xf32>
    %11 = vector.multi_reduction <add>, %10, %cst_6 [1] : vector<8x10xf32> to vector<8xf32>
    %12 = vector.shape_cast %11 : vector<8xf32> to vector<8x1xf32>
    %13 = math.log %12 : vector<8x1xf32>
    %14 = vector.broadcast %13 : vector<8x1xf32> to vector<8x10xf32>
    %15 = arith.subf %9, %14 : vector<8x10xf32>
    %c0_7 = arith.constant 0 : index
    %c0_8 = arith.constant 0 : index
    %16 = vector.load %arg4[%c0_7, %c0_8] : memref<8x10xf32, #tpu.memory_space<vmem>>, vector<8x10xf32>
    tpu.vector_store %arg4[%c0_7, %c0_8], %15 {strides = array<i32>} : memref<8x10xf32, #tpu.memory_space<vmem>>, vector<8x10xf32>,
    return
  }
  func.func @transform_0(%arg0: i32) -> (i32, i32) {
    %c0_i32 = arith.constant 0 : i32
    %c0_i32_0 = arith.constant 0 : i32
    return %arg0, %c0_i32 : i32, i32
  }
  func.func @transform_1(%arg0: i32) -> (i32, i32) {
    %c0_i32 = arith.constant 0 : i32
    %c0_i32_0 = arith.constant 0 : i32
    %c0_i32_1 = arith.constant 0 : i32
    return %c0_i32, %c0_i32_0 : i32, i32
  }
  func.func @transform_2(%arg0: i32) -> (i32, i32) {
    %c0_i32 = arith.constant 0 : i32
    %c0_i32_0 = arith.constant 0 : i32
    %c0_i32_1 = arith.constant 0 : i32
    return %c0_i32, %c0_i32_0 : i32, i32
  }
  func.func @transform_3(%arg0: i32) -> (i32, i32) {
    %c0_i32 = arith.constant 0 : i32
    %c0_i32_0 = arith.constant 0 : i32
    return %arg0, %c0_i32 : i32, i32
  }
}

</mosaic_0001>

<bundles_post_ra>
// kernel: tpu_custom_call.1
= control target key start
LH: loop header
LB: loop body
LE: loop exit
PB: predicated region body
PF: predicated region fallthrough
CT: control target
= control target key end

     0   :  { %8 = vsyncpa [#allocation3], 0  ;;  %s2018_s0 = inlined_call_operand.hbm [shape: f32[8,6144], index: 0, kind: input, shape index: {}]   ;;  %s2019_s1 = inlined_call_operand.hbm [shape: f32[10,6144], index: 1, kind: input, shape index: {}]   ;;  %s2020_s2 = inlined_call_operand.vmem [shape: f32[1,10], index: 2, kind: input, shape index: {}]   ;;  %s2021_s3 = inlined_call_operand.hbm [shape: f32[8,10], index: 3, kind: output, shape index: {}]  }
   0x1   :  { %9 = vsyncpa [#allocation6], 0 }
   0x2   :  { %10 = vsyncpa [#allocation4], 0  ;;  %s1978_s12 = smov [#allocation2]   ;;  %s1979_s14 = smov [#allocation5]  }
   0x3   :  { %s17_s13 = sshll.u32 %s1978_s12, 4  ;;  %s26_s15 = sshll.u32 %s1979_s14, 4  ;;  %s18_s13 = int_to_ptr.vmem [resolvable:$true] %s17_s13  ;;  %s27_s15 = int_to_ptr.vmem [resolvable:$true] %s26_s15 }
   0x4   :  { %s1920_s16 = scalar_lea.vmem %s18_s13, 6144  ;;  %p1925_p1 = scmp.lt.s32.totalorder %s18_s13, %s18_s13 }
   0x5   :  { %p1921_p0 = scmp.ne.s32.totalorder %s18_s13, %s1920_s16  ;;  %p1926_p2 = scmp.lt.s32.totalorder %s1920_s16, %s1920_s16 }
   0x7   :  { %p1927_p3 = por %p1926_p2, %p1925_p1 }
   0x9   :  { %p1928_p4 = pnand %p1927_p3, %p1921_p0 }
   0xb   :  { %1931 = shalt.err (!%p1928_p4)
}
   0xc   :  { %20 = dma.hbm_to_vmem [thread:$0]  %s2018_s0, 6144, %s18_s13, [#allocation3]  }
   0xd   :  { %s1940_s19 = scalar_lea.vmem %s27_s15, 12288  ;;  %p1945_p6 = scmp.lt.s32.totalorder %s27_s15, %s27_s15 }
   0xe   :  { %p1941_p5 = scmp.ne.s32.totalorder %s27_s15, %s1940_s19  ;;  %p1946_p7 = scmp.lt.s32.totalorder %s1940_s19, %s1940_s19 }
  0x10   :  { %p1947_p8 = por %p1946_p7, %p1945_p6 }
  0x12   :  { %p1948_p9 = pnand %p1947_p8, %p1941_p5 }
  0x14   :  { %1951 = shalt.err (!%p1948_p9)
}
  0x15   :  { %s1980_s20 = smov 6144   ;;  %s1981_s21 = smov 384  }
  0x16   :  { %32 = dma.hbm_to_vmem [thread:$0]  %s2019_s1, 12288, %s27_s15, [#allocation6], %s1980_s20, %s1980_s20, %s1981_s21  }
  0x17   :  { %1972 = dma.done.wait [#allocation3], 6144  }
  0x18   :  { %1973 = vsyncadd [#allocation3], 4294961152 }
  0x19   :  { %1974 = dma.done.wait [#allocation6], 12288  }
  0x1a   :  { %1975 = vsyncadd [#allocation6], 4294955008  ;;  %v138_v0 = vld [vmem:[#allocation5 + $0x188] sm:$0x3]  ;;  %v140_v1 = vld [vmem:[#allocation5 + $0x198] sm:$0x3] }
  0x1b   :  { %v137_v2 = vld [vmem:[#allocation5 + $0x180] sm:$0x3]  ;;  %220 = vmatprep.subr.mxu0 %v138_v0  ;;  %290 = vmatprep.subr.mxu1 %v140_v1  ;;  %v139_v3 = vld [vmem:[#allocation5 + $0x190] sm:$0x3]  ;;  %v90_v4 = vld [vmem:[#allocation5 + $0x8] sm:$0xff]  ;;  %vm1872_vm0 = vcmask 80896  }
  0x1c   :  { %v92_v5 = vld [vmem:[#allocation5 + $0x18] sm:$0xff]  ;;  %221 = vmatpush1.xpose.msra.mxu0 %v137_v2  ;;  %291 = vmatpush1.xpose.msra.mxu1 %v139_v3  ;;  %v42_v6 = vld [vmem:[#allocation2 + $0x8] sm:$0xff]  ;;  %v89_v7 = vld [vmem:[#allocation5] sm:$0xff] }
  0x1d   :  { %222 = vmatprep.subr.mxu0 %v90_v4  ;;  %292 = vmatprep.subr.mxu1 %v92_v5  ;;  %v91_v8 = vld [vmem:[#allocation5 + $0x10] sm:$0xff]  ;;  %v44_v9 = vld [vmem:[#allocation2 + $0x18] sm:$0xff]  ;;  %v142_v10 = vld [vmem:[#allocation5 + $0x1a8] sm:$0x3] }
  0x1e   :  { %256 = vmatprep.mubr.f32.mxu0 %v42_v6  ;;  %326 = vmatprep.mubr.f32.mxu1 %v44_v9  ;;  %v144_v11 = vld [vmem:[#allocation5 + $0x1b8] sm:$0x3]  ;;  %v41_v12 = vld [vmem:[#allocation2] sm:$0xff]  ;;  %v43_v13 = vld [vmem:[#allocation2 + $0x10] sm:$0xff] }
  0x1f   :  { %v141_v14 = vld [vmem:[#allocation5 + $0x1a0] sm:$0x3]  ;;  %v143_v15 = vld [vmem:[#allocation5 + $0x1b0] sm:$0x3]  ;;  %v94_v16 = vld [vmem:[#allocation5 + $0x28] sm:$0xff] }
  0x20   :  { %223 = vmatpush1.xpose.msra.mxu0 %v89_v7  ;;  %293 = vmatpush1.xpose.msra.mxu1 %v91_v8  ;;  %v96_v17 = vld [vmem:[#allocation5 + $0x38] sm:$0xff]  ;;  %v46_v18 = vld [vmem:[#allocation2 + $0x28] sm:$0xff]  ;;  %v93_v20 = vld [vmem:[#allocation5 + $0x20] sm:$0xff] }
  0x21   :  { %360 = vmatprep.subr.mxu0 %v142_v10  ;;  %430 = vmatprep.subr.mxu1 %v144_v11  ;;  %v48_v19 = vld [vmem:[#allocation2 + $0x38] sm:$0xff]  ;;  %v95_v21 = vld [vmem:[#allocation5 + $0x30] sm:$0xff]  ;;  %v146_v22 = vld [vmem:[#allocation5 + $0x1c8] sm:$0x3] }
  0x22   :  { %v148_v23 = vld [vmem:[#allocation5 + $0x1d8] sm:$0x3]  ;;  %v45_v24 = vld [vmem:[#allocation2 + $0x20] sm:$0xff]  ;;  %v47_v25 = vld [vmem:[#allocation2 + $0x30] sm:$0xff] }
  0x23   :  { %257 = vmatmul.mubr.f32.vlgmr.msra.gmra.mxu0 %v41_v12  ;;  %327 = vmatmul.mubr.f32.vlgmr.msra.gmra.mxu1 %v43_v13  ;;  %v145_v26 = vld [vmem:[#allocation5 + $0x1c0] sm:$0x3]  ;;  %v147_v27 = vld [vmem:[#allocation5 + $0x1d0] sm:$0x3]  ;;  %v98_v28 = vld [vmem:[#allocation5 + $0x48] sm:$0xff] }
  0x24   :  { %361 = vmatpush1.xpose.msra.mxu0 %v141_v14  ;;  %431 = vmatpush1.xpose.msra.mxu1 %v143_v15  ;;  %v100_v29 = vld [vmem:[#allocation5 + $0x58] sm:$0xff]  ;;  %v50_v30 = vld [vmem:[#allocation2 + $0x48] sm:$0xff]  ;;  %v97_v32 = vld [vmem:[#allocation5 + $0x40] sm:$0xff] }
  0x25   :  { %362 = vmatprep.subr.mxu0 %v94_v16  ;;  %432 = vmatprep.subr.mxu1 %v96_v17  ;;  %v52_v31 = vld [vmem:[#allocation2 + $0x58] sm:$0xff]  ;;  %v99_v33 = vld [vmem:[#allocation5 + $0x50] sm:$0xff]  ;;  %v150_v34 = vld [vmem:[#allocation5 + $0x1e8] sm:$0x3] }
  0x26   :  { %396 = vmatprep.mubr.f32.mxu0 %v46_v18  ;;  %466 = vmatprep.mubr.f32.mxu1 %v48_v19  ;;  %v152_v35 = vld [vmem:[#allocation5 + $0x1f8] sm:$0x3]  ;;  %v49_v36 = vld [vmem:[#allocation2 + $0x40] sm:$0xff]  ;;  %v51_v37 = vld [vmem:[#allocation2 + $0x50] sm:$0xff] }
  0x27   :  { %v149_v38 = vld [vmem:[#allocation5 + $0x1e0] sm:$0x3]  ;;  %v151_v39 = vld [vmem:[#allocation5 + $0x1f0] sm:$0x3]  ;;  %v102_v40 = vld [vmem:[#allocation5 + $0x68] sm:$0xff] }
  0x28   :  { %363 = vmatpush1.xpose.msra.mxu0 %v93_v20  ;;  %433 = vmatpush1.xpose.msra.mxu1 %v95_v21  ;;  %v104_v41 = vld [vmem:[#allocation5 + $0x78] sm:$0xff]  ;;  %v54_v42 = vld [vmem:[#allocation2 + $0x68] sm:$0xff]  ;;  %v101_v44 = vld [vmem:[#allocation5 + $0x60] sm:$0xff] }
  0x29   :  { %500 = vmatprep.subr.mxu0 %v146_v22  ;;  %570 = vmatprep.subr.mxu1 %v148_v23  ;;  %v56_v43 = vld [vmem:[#allocation2 + $0x78] sm:$0xff]  ;;  %v103_v45 = vld [vmem:[#allocation5 + $0x70] sm:$0xff]  ;;  %v154_v46 = vld [vmem:[#allocation5 + $0x208] sm:$0x3] }
  0x2a   :  { %v156_v47 = vld [vmem:[#allocation5 + $0x218] sm:$0x3]  ;;  %v53_v48 = vld [vmem:[#allocation2 + $0x60] sm:$0xff]  ;;  %v55_v49 = vld [vmem:[#allocation2 + $0x70] sm:$0xff] }
  0x2b   :  { %397 = vmatmul.mubr.f32.vlgmr.msra.gmra.mxu0 %v45_v24  ;;  %467 = vmatmul.mubr.f32.vlgmr.msra.gmra.mxu1 %v47_v25  ;;  %v153_v50 = vld [vmem:[#allocation5 + $0x200] sm:$0x3]  ;;  %v155_v51 = vld [vmem:[#allocation5 + $0x210] sm:$0x3]  ;;  %v106_v52 = vld [vmem:[#allocation5 + $0x88] sm:$0xff] }
  0x2c   :  { %501 = vmatpush1.xpose.msra.mxu0 %v145_v26  ;;  %571 = vmatpush1.xpose.msra.mxu1 %v147_v27  ;;  %v108_v53 = vld [vmem:[#allocation5 + $0x98] sm:$0xff]  ;;  %v58_v54 = vld [vmem:[#allocation2 + $0x88] sm:$0xff]  ;;  %v105_v56 = vld [vmem:[#allocation5 + $0x80] sm:$0xff] }
  0x2d   :  { %502 = vmatprep.subr.mxu0 %v98_v28  ;;  %572 = vmatprep.subr.mxu1 %v100_v29  ;;  %v60_v55 = vld [vmem:[#allocation2 + $0x98] sm:$0xff]  ;;  %v107_v57 = vld [vmem:[#allocation5 + $0x90] sm:$0xff]  ;;  %v158_v58 = vld [vmem:[#allocation5 + $0x228] sm:$0x3] }
  0x2e   :  { %536 = vmatprep.mubr.f32.mxu0 %v50_v30  ;;  %606 = vmatprep.mubr.f32.mxu1 %v52_v31  ;;  %v160_v59 = vld [vmem:[#allocation5 + $0x238] sm:$0x3]  ;;  %v57_v60 = vld [vmem:[#allocation2 + $0x80] sm:$0xff]  ;;  %v59_v61 = vld [vmem:[#allocation2 + $0x90] sm:$0xff] }
  0x2f   :  { %v157_v62 = vld [vmem:[#allocation5 + $0x220] sm:$0x3]  ;;  %v159_v63 = vld [vmem:[#allocation5 + $0x230] sm:$0x3]  ;;  %v110_v0 = vld [vmem:[#allocation5 + $0xa8] sm:$0xff] }
  0x30   :  { %503 = vmatpush1.xpose.msra.mxu0 %v97_v32  ;;  %573 = vmatpush1.xpose.msra.mxu1 %v99_v33  ;;  %v112_v1 = vld [vmem:[#allocation5 + $0xb8] sm:$0xff]  ;;  %v62_v2 = vld [vmem:[#allocation2 + $0xa8] sm:$0xff]  ;;  %v109_v4 = vld [vmem:[#allocation5 + $0xa0] sm:$0xff] }
  0x31   :  { %640 = vmatprep.subr.mxu0 %v150_v34  ;;  %710 = vmatprep.subr.mxu1 %v152_v35  ;;  %v64_v3 = vld [vmem:[#allocation2 + $0xb8] sm:$0xff]  ;;  %v111_v5 = vld [vmem:[#allocation5 + $0xb0] sm:$0xff]  ;;  %v162_v6 = vld [vmem:[#allocation5 + $0x248] sm:$0x3] }
  0x32   :  { %v164_v7 = vld [vmem:[#allocation5 + $0x258] sm:$0x3]  ;;  %v61_v8 = vld [vmem:[#allocation2 + $0xa0] sm:$0xff]  ;;  %v63_v9 = vld [vmem:[#allocation2 + $0xb0] sm:$0xff] }
  0x33   :  { %537 = vmatmul.mubr.f32.vlgmr.msra.gmra.mxu0 %v49_v36  ;;  %607 = vmatmul.mubr.f32.vlgmr.msra.gmra.mxu1 %v51_v37  ;;  %v161_v10 = vld [vmem:[#allocation5 + $0x240] sm:$0x3]  ;;  %v163_v11 = vld [vmem:[#allocation5 + $0x250] sm:$0x3]  ;;  %v114_v12 = vld [vmem:[#allocation5 + $0xc8] sm:$0xff] }
  0x34   :  { %641 = vmatpush1.xpose.msra.mxu0 %v149_v38  ;;  %711 = vmatpush1.xpose.msra.mxu1 %v151_v39  ;;  %v116_v13 = vld [vmem:[#allocation5 + $0xd8] sm:$0xff]  ;;  %v66_v14 = vld [vmem:[#allocation2 + $0xc8] sm:$0xff]  ;;  %v113_v16 = vld [vmem:[#allocation5 + $0xc0] sm:$0xff] }
  0x35   :  { %642 = vmatprep.subr.mxu0 %v102_v40  ;;  %712 = vmatprep.subr.mxu1 %v104_v41  ;;  %v68_v15 = vld [vmem:[#allocation2 + $0xd8] sm:$0xff]  ;;  %v115_v17 = vld [vmem:[#allocation5 + $0xd0] sm:$0xff]  ;;  %v166_v18 = vld [vmem:[#allocation5 + $0x268] sm:$0x3] }
  0x36   :  { %676 = vmatprep.mubr.f32.mxu0 %v54_v42  ;;  %746 = vmatprep.mubr.f32.mxu1 %v56_v43  ;;  %v168_v19 = vld [vmem:[#allocation5 + $0x278] sm:$0x3]  ;;  %v65_v20 = vld [vmem:[#allocation2 + $0xc0] sm:$0xff]  ;;  %v67_v21 = vld [vmem:[#allocation2 + $0xd0] sm:$0xff] }
  0x37   :  { %v165_v22 = vld [vmem:[#allocation5 + $0x260] sm:$0x3]  ;;  %v167_v23 = vld [vmem:[#allocation5 + $0x270] sm:$0x3]  ;;  %v118_v24 = vld [vmem:[#allocation5 + $0xe8] sm:$0xff] }
  0x38   :  { %643 = vmatpush1.xpose.msra.mxu0 %v101_v44  ;;  %713 = vmatpush1.xpose.msra.mxu1 %v103_v45  ;;  %v120_v25 = vld [vmem:[#allocation5 + $0xf8] sm:$0xff]  ;;  %v70_v26 = vld [vmem:[#allocation2 + $0xe8] sm:$0xff]  ;;  %v117_v28 = vld [vmem:[#allocation5 + $0xe0] sm:$0xff] }
  0x39   :  { %780 = vmatprep.subr.mxu0 %v154_v46  ;;  %850 = vmatprep.subr.mxu1 %v156_v47  ;;  %v72_v27 = vld [vmem:[#allocation2 + $0xf8] sm:$0xff]  ;;  %v119_v29 = vld [vmem:[#allocation5 + $0xf0] sm:$0xff]  ;;  %v170_v30 = vld [vmem:[#allocation5 + $0x288] sm:$0x3] }
  0x3a   :  { %v172_v31 = vld [vmem:[#allocation5 + $0x298] sm:$0x3]  ;;  %v69_v32 = vld [vmem:[#allocation2 + $0xe0] sm:$0xff]  ;;  %v71_v33 = vld [vmem:[#allocation2 + $0xf0] sm:$0xff] }
  0x3b   :  { %677 = vmatmul.mubr.f32.vlgmr.msra.gmra.mxu0 %v53_v48  ;;  %747 = vmatmul.mubr.f32.vlgmr.msra.gmra.mxu1 %v55_v49  ;;  %v169_v34 = vld [vmem:[#allocation5 + $0x280] sm:$0x3]  ;;  %v171_v35 = vld [vmem:[#allocation5 + $0x290] sm:$0x3]  ;;  %v122_v36 = vld [vmem:[#allocation5 + $0x108] sm:$0xff] }
  0x3c   :  { %781 = vmatpush1.xpose.msra.mxu0 %v153_v50  ;;  %851 = vmatpush1.xpose.msra.mxu1 %v155_v51  ;;  %v124_v37 = vld [vmem:[#allocation5 + $0x118] sm:$0xff]  ;;  %v74_v38 = vld [vmem:[#allocation2 + $0x108] sm:$0xff]  ;;  %v121_v40 = vld [vmem:[#allocation5 + $0x100] sm:$0xff] }
  0x3d   :  { %782 = vmatprep.subr.mxu0 %v106_v52  ;;  %852 = vmatprep.subr.mxu1 %v108_v53  ;;  %v76_v39 = vld [vmem:[#allocation2 + $0x118] sm:$0xff]  ;;  %v123_v41 = vld [vmem:[#allocation5 + $0x110] sm:$0xff]  ;;  %v174_v42 = vld [vmem:[#allocation5 + $0x2a8] sm:$0x3] }
  0x3e   :  { %816 = vmatprep.mubr.f32.mxu0 %v58_v54  ;;  %886 = vmatprep.mubr.f32.mxu1 %v60_v55  ;;  %v176_v43 = vld [vmem:[#allocation5 + $0x2b8] sm:$0x3]  ;;  %v73_v44 = vld [vmem:[#allocation2 + $0x100] sm:$0xff]  ;;  %v75_v45 = vld [vmem:[#allocation2 + $0x110] sm:$0xff] }
  0x3f   :  { %v173_v46 = vld [vmem:[#allocation5 + $0x2a0] sm:$0x3]  ;;  %v175_v47 = vld [vmem:[#allocation5 + $0x2b0] sm:$0x3]  ;;  %v126_v48 = vld [vmem:[#allocation5 + $0x128] sm:$0xff] }
  0x40   :  { %783 = vmatpush1.xpose.msra.mxu0 %v105_v56  ;;  %853 = vmatpush1.xpose.msra.mxu1 %v107_v57  ;;  %v128_v49 = vld [vmem:[#allocation5 + $0x138] sm:$0xff]  ;;  %v78_v50 = vld [vmem:[#allocation2 + $0x128] sm:$0xff]  ;;  %v125_v52 = vld [vmem:[#allocation5 + $0x120] sm:$0xff] }
  0x41   :  { %920 = vmatprep.subr.mxu0 %v158_v58  ;;  %990 = vmatprep.subr.mxu1 %v160_v59  ;;  %v80_v51 = vld [vmem:[#allocation2 + $0x138] sm:$0xff]  ;;  %v127_v53 = vld [vmem:[#allocation5 + $0x130] sm:$0xff]  ;;  %v178_v54 = vld [vmem:[#allocation5 + $0x2c8] sm:$0x3] }
  0x42   :  { %v180_v55 = vld [vmem:[#allocation5 + $0x2d8] sm:$0x3]  ;;  %v77_v56 = vld [vmem:[#allocation2 + $0x120] sm:$0xff]  ;;  %v79_v57 = vld [vmem:[#allocation2 + $0x130] sm:$0xff] }
  0x43   :  { %817 = vmatmul.mubr.f32.vlgmr.msra.gmra.mxu0 %v57_v60  ;;  %887 = vmatmul.mubr.f32.vlgmr.msra.gmra.mxu1 %v59_v61  ;;  %v177_v58 = vld [vmem:[#allocation5 + $0x2c0] sm:$0x3]  ;;  %v179_v59 = vld [vmem:[#allocation5 + $0x2d0] sm:$0x3]  ;;  %v130_v60 = vld [vmem:[#allocation5 + $0x148] sm:$0xff] }
  0x44   :  { %921 = vmatpush1.xpose.msra.mxu0 %v157_v62  ;;  %991 = vmatpush1.xpose.msra.mxu1 %v159_v63  ;;  %v132_v61 = vld [vmem:[#allocation5 + $0x158] sm:$0xff]  ;;  %v82_v62 = vld [vmem:[#allocation2 + $0x148] sm:$0xff] }
  0x45   :  { %922 = vmatprep.subr.mxu0 %v110_v0  ;;  %992 = vmatprep.subr.mxu1 %v112_v1  ;;  %v84_v63 = vld [vmem:[#allocation2 + $0x158] sm:$0xff]  ;;  %v129_v0 = vld [vmem:[#allocation5 + $0x140] sm:$0xff]  ;;  %v131_v1 = vld [vmem:[#allocation5 + $0x150] sm:$0xff] }
  0x46   :  { %956 = vmatprep.mubr.f32.mxu0 %v62_v2  ;;  %1026 = vmatprep.mubr.f32.mxu1 %v64_v3  ;;  %v182_v2 = vld [vmem:[#allocation5 + $0x2e8] sm:$0x3]  ;;  %v184_v3 = vld [vmem:[#allocation5 + $0x2f8] sm:$0x3] }
  0x48   :  { %923 = vmatpush1.xpose.msra.mxu0 %v109_v4  ;;  %993 = vmatpush1.xpose.msra.mxu1 %v111_v5  ;;  %v81_v4 = vld [vmem:[#allocation2 + $0x140] sm:$0xff]  ;;  %v83_v5 = vld [vmem:[#allocation2 + $0x150] sm:$0xff] }
  0x49   :  { %1060 = vmatprep.subr.mxu0 %v162_v6  ;;  %1130 = vmatprep.subr.mxu1 %v164_v7  ;;  %v181_v6 = vld [vmem:[#allocation5 + $0x2e0] sm:$0x3]  ;;  %v183_v7 = vld [vmem:[#allocation5 + $0x2f0] sm:$0x3] }
  0x4b   :  { %957 = vmatmul.mubr.f32.vlgmr.msra.gmra.mxu0 %v61_v8  ;;  %1027 = vmatmul.mubr.f32.vlgmr.msra.gmra.mxu1 %v63_v9  ;;  %v134_v8 = vld [vmem:[#allocation5 + $0x168] sm:$0xff]  ;;  %v136_v9 = vld [vmem:[#allocation5 + $0x178] sm:$0xff] }
  0x4c   :  { %1061 = vmatpush1.xpose.msra.mxu0 %v161_v10  ;;  %1131 = vmatpush1.xpose.msra.mxu1 %v163_v11  ;;  %v86_v10 = vld [vmem:[#allocation2 + $0x168] sm:$0xff]  ;;  %v88_v11 = vld [vmem:[#allocation2 + $0x178] sm:$0xff] }
  0x4d   :  { %1062 = vmatprep.subr.mxu0 %v114_v12  ;;  %1132 = vmatprep.subr.mxu1 %v116_v13  ;;  %v133_v12 = vld [vmem:[#allocation5 + $0x160] sm:$0xff]  ;;  %v135_v13 = vld [vmem:[#allocation5 + $0x170] sm:$0xff] }
  0x4e   :  { %1096 = vmatprep.mubr.f32.mxu0 %v66_v14  ;;  %1166 = vmatprep.mubr.f32.mxu1 %v68_v15  ;;  %v85_v14 = vld [vmem:[#allocation2 + $0x160] sm:$0xff]  ;;  %v87_v15 = vld [vmem:[#allocation2 + $0x170] sm:$0xff] }
  0x50   :  { %1063 = vmatpush1.xpose.msra.mxu0 %v113_v16  ;;  %1133 = vmatpush1.xpose.msra.mxu1 %v115_v17 }
  0x51   :  { %1200 = vmatprep.subr.mxu0 %v166_v18  ;;  %1270 = vmatprep.subr.mxu1 %v168_v19 }
  0x53   :  { %1097 = vmatmul.mubr.f32.vlgmr.msra.gmra.mxu0 %v65_v20  ;;  %1167 = vmatmul.mubr.f32.vlgmr.msra.gmra.mxu1 %v67_v21 }
  0x54   :  { %1201 = vmatpush1.xpose.msra.mxu0 %v165_v22  ;;  %1271 = vmatpush1.xpose.msra.mxu1 %v167_v23 }
  0x55   :  { %1202 = vmatprep.subr.mxu0 %v118_v24  ;;  %1272 = vmatprep.subr.mxu1 %v120_v25 }
  0x56   :  { %1236 = vmatprep.mubr.f32.mxu0 %v70_v26  ;;  %1306 = vmatprep.mubr.f32.mxu1 %v72_v27 }
  0x58   :  { %1203 = vmatpush1.xpose.msra.mxu0 %v117_v28  ;;  %1273 = vmatpush1.xpose.msra.mxu1 %v119_v29  ;;  %v1902_v28 = vld [vmem:[%s2020_s2] ss:$0 sm:$0xff]  ;;  %s1982_s2 = smov [#allocation7]  }
  0x59   :  { %1340 = vmatprep.subr.mxu0 %v170_v30  ;;  %1410 = vmatprep.subr.mxu1 %v172_v31  ;;  %s1892_s24 = sshll.u32 %s1982_s2, 4  ;;  %s1893_s24 = int_to_ptr.vmem [resolvable:$true] %s1892_s24 }
  0x5a   :  { %s1952_s25 = scalar_lea.vmem %s1893_s24, 128  ;;  %p1957_p11 = scmp.lt.s32.totalorder %s1893_s24, %s1893_s24 }
  0x5b   :  { %1237 = vmatmul.mubr.f32.vlgmr.msra.gmra.mxu0 %v69_v32  ;;  %1307 = vmatmul.mubr.f32.vlgmr.msra.gmra.mxu1 %v71_v33  ;;  %p1953_p10 = scmp.ne.s32.totalorder %s1893_s24, %s1952_s25  ;;  %p1958_p12 = scmp.lt.s32.totalorder %s1952_s25, %s1952_s25 }
  0x5c   :  { %1341 = vmatpush1.xpose.msra.mxu0 %v169_v34  ;;  %1411 = vmatpush1.xpose.msra.mxu1 %v171_v35 }
  0x5d   :  { %1342 = vmatprep.subr.mxu0 %v122_v36  ;;  %1412 = vmatprep.subr.mxu1 %v124_v37  ;;  %p1959_p13 = por %p1958_p12, %p1957_p11 }
  0x5e   :  { %1376 = vmatprep.mubr.f32.mxu0 %v74_v38  ;;  %1446 = vmatprep.mubr.f32.mxu1 %v76_v39 }
  0x5f   :  { %p1960_p0 = pnand %p1959_p13, %p1953_p10 }
  0x60   :  { %1343 = vmatpush1.xpose.msra.mxu0 %v121_v40  ;;  %1413 = vmatpush1.xpose.msra.mxu1 %v123_v41 }
  0x61   :  { %1480 = vmatprep.subr.mxu0 %v174_v42  ;;  %1550 = vmatprep.subr.mxu1 %v176_v43 }
  0x63   :  { %1377 = vmatmul.mubr.f32.vlgmr.msra.gmra.mxu0 %v73_v44  ;;  %1447 = vmatmul.mubr.f32.vlgmr.msra.gmra.mxu1 %v75_v45 }
  0x64   :  { %1481 = vmatpush1.xpose.msra.mxu0 %v173_v46  ;;  %1551 = vmatpush1.xpose.msra.mxu1 %v175_v47 }
  0x65   :  { %1482 = vmatprep.subr.mxu0 %v126_v48  ;;  %1552 = vmatprep.subr.mxu1 %v128_v49 }
  0x66   :  { %1516 = vmatprep.mubr.f32.mxu0 %v78_v50  ;;  %1586 = vmatprep.mubr.f32.mxu1 %v80_v51 }
  0x68   :  { %1483 = vmatpush1.xpose.msra.mxu0 %v125_v52  ;;  %1553 = vmatpush1.xpose.msra.mxu1 %v127_v53 }
  0x69   :  { %1620 = vmatprep.subr.mxu0 %v178_v54  ;;  %1690 = vmatprep.subr.mxu1 %v180_v55 }
  0x6b   :  { %1517 = vmatmul.mubr.f32.vlgmr.msra.gmra.mxu0 %v77_v56  ;;  %1587 = vmatmul.mubr.f32.vlgmr.msra.gmra.mxu1 %v79_v57 }
  0x6c   :  { %1621 = vmatpush1.xpose.msra.mxu0 %v177_v58  ;;  %1691 = vmatpush1.xpose.msra.mxu1 %v179_v59 }
  0x6d   :  { %1622 = vmatprep.subr.mxu0 %v130_v60  ;;  %1692 = vmatprep.subr.mxu1 %v132_v61 }
  0x6e   :  { %1656 = vmatprep.mubr.f32.mxu0 %v82_v62  ;;  %1726 = vmatprep.mubr.f32.mxu1 %v84_v63 }
  0x70   :  { %1623 = vmatpush1.xpose.msra.mxu0 %v129_v0  ;;  %1693 = vmatpush1.xpose.msra.mxu1 %v131_v1 }
  0x71   :  { %1760 = vmatprep.subr.mxu0 %v182_v2  ;;  %1830 = vmatprep.subr.mxu1 %v184_v3 }
  0x73   :  { %1657 = vmatmul.mubr.f32.vlgmr.msra.gmra.mxu0 %v81_v4  ;;  %1727 = vmatmul.mubr.f32.vlgmr.msra.gmra.mxu1 %v83_v5 }
  0x74   :  { %1761 = vmatpush1.xpose.msra.mxu0 %v181_v6  ;;  %1831 = vmatpush1.xpose.msra.mxu1 %v183_v7 }
  0x75   :  { %1762 = vmatprep.subr.mxu0 %v134_v8  ;;  %1832 = vmatprep.subr.mxu1 %v136_v9 }
  0x76   :  { %1796 = vmatprep.mubr.f32.mxu0 %v86_v10  ;;  %1866 = vmatprep.mubr.f32.mxu1 %v88_v11 }
  0x78   :  { %1763 = vmatpush1.xpose.msra.mxu0 %v133_v12  ;;  %1833 = vmatpush1.xpose.msra.mxu1 %v135_v13 }
  0x7b   :  { %1797 = vmatmul.mubr.f32.vlgmr.msra.gmra.mxu0 %v85_v14  ;;  %1867 = vmatmul.mubr.f32.vlgmr.msra.gmra.mxu1 %v87_v15 }
  0xe3   :  { %v258_v16 = vpop.f32.mrf.mxu0  ;;  %v328_v17 = vpop.f32.mrf.mxu1 }
  0xe4   :  { %v259_v29 = vadd.f32 %v1902_v28, %v258_v16 }
  0xe5   :  { %v260_v18 = vpop.f32.mrf.mxu0  ;;  %v330_v19 = vpop.f32.mrf.mxu1 }
  0xe6   :  { %v329_v34 = vadd.f32 %v328_v17, %v259_v29 }
  0xeb   :  { %v398_v20 = vpop.f32.mrf.mxu0  ;;  %v468_v21 = vpop.f32.mrf.mxu1 }
  0xec   :  { %v399_v35 = vadd.f32 %v398_v20, %v329_v34 }
  0xed   :  { %v400_v22 = vpop.f32.mrf.mxu0  ;;  %v470_v23 = vpop.f32.mrf.mxu1 }
  0xee   :  { %v469_v38 = vadd.f32 %v468_v21, %v399_v35 }
  0xf3   :  { %v538_v24 = vpop.f32.mrf.mxu0  ;;  %v608_v25 = vpop.f32.mrf.mxu1 }
  0xf4   :  { %v539_v41 = vadd.f32 %v538_v24, %v469_v38 }
  0xf5   :  { %v540_v26 = vpop.f32.mrf.mxu0  ;;  %v610_v27 = vpop.f32.mrf.mxu1 }
  0xf6   :  { %v609_v42 = vadd.f32 %v608_v25, %v539_v41 }
  0xfb   :  { %v678_v30 = vpop.f32.mrf.mxu0  ;;  %v748_v31 = vpop.f32.mrf.mxu1 }
  0xfc   :  { %v679_v45 = vadd.f32 %v678_v30, %v609_v42 }
  0xfd   :  { %v680_v32 = vpop.f32.mrf.mxu0  ;;  %v750_v33 = vpop.f32.mrf.mxu1 }
  0xfe   :  { %v749_v48 = vadd.f32 %v748_v31, %v679_v45 }
 0x103   :  { %v818_v36 = vpop.f32.mrf.mxu0  ;;  %v888_v37 = vpop.f32.mrf.mxu1 }
 0x104   :  { %v819_v49 = vadd.f32 %v818_v36, %v749_v48 }
 0x105   :  { %v820_v39 = vpop.f32.mrf.mxu0  ;;  %v890_v40 = vpop.f32.mrf.mxu1 }
 0x106   :  { %v889_v54 = vadd.f32 %v888_v37, %v819_v49 }
 0x10b   :  { %v958_v43 = vpop.f32.mrf.mxu0  ;;  %v1028_v44 = vpop.f32.mrf.mxu1 }
 0x10c   :  { %v959_v55 = vadd.f32 %v958_v43, %v889_v54 }
 0x10d   :  { %v960_v46 = vpop.f32.mrf.mxu0  ;;  %v1030_v47 = vpop.f32.mrf.mxu1 }
 0x10e   :  { %v1029_v58 = vadd.f32 %v1028_v44, %v959_v55 }
 0x113   :  { %v1098_v50 = vpop.f32.mrf.mxu0  ;;  %v1168_v51 = vpop.f32.mrf.mxu1 }
 0x114   :  { %v1099_v61 = vadd.f32 %v1098_v50, %v1029_v58 }
 0x115   :  { %v1100_v52 = vpop.f32.mrf.mxu0  ;;  %v1170_v53 = vpop.f32.mrf.mxu1 }
 0x116   :  { %v1169_v62 = vadd.f32 %v1168_v51, %v1099_v61 }
 0x11b   :  { %v1238_v56 = vpop.f32.mrf.mxu0  ;;  %v1308_v57 = vpop.f32.mrf.mxu1 }
 0x11c   :  { %v1239_v1 = vadd.f32 %v1238_v56, %v1169_v62 }
 0x11d   :  { %v1240_v59 = vpop.f32.mrf.mxu0  ;;  %v1310_v60 = vpop.f32.mrf.mxu1 }
 0x11e   :  { %v1309_v4 = vadd.f32 %v1308_v57, %v1239_v1 }
 0x123   :  { %v1378_v63 = vpop.f32.mrf.mxu0  ;;  %v1448_v0 = vpop.f32.mrf.mxu1 }
 0x124   :  { %v1379_v5 = vadd.f32 %v1378_v63, %v1309_v4 }
 0x125   :  { %v1380_v2 = vpop.f32.mrf.mxu0  ;;  %v1450_v3 = vpop.f32.mrf.mxu1 }
 0x126   :  { %v1449_v10 = vadd.f32 %v1448_v0, %v1379_v5 }
 0x12b   :  { %v1518_v6 = vpop.f32.mrf.mxu0  ;;  %v1588_v7 = vpop.f32.mrf.mxu1 }
 0x12c   :  { %v1519_v11 = vadd.f32 %v1518_v6, %v1449_v10 }
 0x12d   :  { %v1520_v8 = vpop.f32.mrf.mxu0  ;;  %v1590_v9 = vpop.f32.mrf.mxu1 }
 0x12e   :  { %v1589_v14 = vadd.f32 %v1588_v7, %v1519_v11 }
 0x133   :  { %v1658_v12 = vpop.f32.mrf.mxu0  ;;  %v1728_v13 = vpop.f32.mrf.mxu1 }
 0x134   :  { %v1659_v17 = vadd.f32 %v1658_v12, %v1589_v14 }
 0x135   :  { %v1660_v15 = vpop.f32.mrf.mxu0  ;;  %v1730_v16 = vpop.f32.mrf.mxu1 }
 0x136   :  { %v1729_v18 = vadd.f32 %v1728_v13, %v1659_v17 }
 0x13b   :  { %v1798_v19 = vpop.f32.mrf.mxu0  ;;  %v1868_v20 = vpop.f32.mrf.mxu1 }
 0x13c   :  { %v1799_v21 = vadd.f32 %v1798_v19, %v1729_v18 }
 0x13d   :  { %v1800_v22 = vpop.f32.mrf.mxu0  ;;  %v1870_v23 = vpop.f32.mrf.mxu1 }
 0x13e   :  { %v1869_v24 = vadd.f32 %v1868_v20, %v1799_v21 }
 0x140   :  { %v1873_v25 = vsel %vm1872_vm0, %v1869_v24, -inf }
 0x141   :  { %1874 = vmax.xlane.f32.xlu0 %v1873_v25 }
 0x1ca   :  { %v1875_v26 = vpop.xlane.xlu0 %1874 }
 0x1cb   :  { %v1876_v27 = vsub.f32 %v1869_v24, %v1875_v26 }
 0x1cd   :  { %v1877_v28 = vmul.f32 1.442695, %v1876_v27 }
 0x1cf   :  { %1908 = vpow2.f32 %v1877_v28 }
 0x1dc   :  { %v1909_v29 = vpop.eup %1908 }
 0x1dd   :  { %v1879_v30 = vsel %vm1872_vm0, %v1909_v29, 0.0 }
 0x1de   :  { %1880 = vadd.xlane.f32.xlu0 %v1879_v30 }
 0x267   :  { %v1881_v31 = vpop.xlane.xlu0 %1880 }
 0x268   :  { %1910 = vlog2.f32 %v1881_v31 }
 0x275   :  { %v1911_v32 = vpop.eup %1910 }
 0x276   :  { %v1883_v33 = vmul.f32 0.6931472, %v1911_v32 }
 0x278   :  { %v1884_v34 = vsub.f32 %v1876_v27, %v1883_v33 }
 0x27a   :  { %1885 = vst.msk [vmem:[#allocation7] sm:$0xff] %vm1872_vm0, %v1884_v34 }
 0x27b   :  { %1963 = shalt.err (!%p1960_p0)
}
 0x27c   :  { %1895 = dma.vmem_to_hbm [thread:$0]  %s1893_s24, 128, %s2021_s3, [#allocation4]  }
 0x27d   :  { %1976 = dma.done.wait [#allocation4], 128  }
 0x27e   :  { %1977 = vsyncadd [#allocation4], 4294967168 }
 0x27f   :  { %1899 = vsyncpa [#allocation3], 1 }
 0x280   :  { %1900 = vsyncpa [#allocation6], 1 }
 0x281   :  { %1901 = vsyncpa [#allocation4], 1 }

</bundles_post_ra>
